<compile_context>
chip_gen: v7x
topology: tpu7x:2x2x1
jax: 0.10.0
libtpu: 0.0.40
codegen_flags: <defaults>
</compile_context>

<pallas_src>
import math
import functools

import jax
import jax.numpy as jnp
from jax import lax
from jax.experimental import pallas as pl
from jax.experimental.pallas import tpu as pltpu


NEG_INF = -1000000000.0   # same fill value as the PyTorch reference


def _mha_kernel(xq_ref, xk_ref, xv_ref, mask_ref,
                wq_ref, bq_ref, wk_ref, bk_ref,
                wv_ref, bv_ref, wo_ref, bo_ref,
                out_ref, *, num_heads, d_k):
    f32 = jnp.float32
    bf16 = jnp.bfloat16

    # ---- projections: bf16 MXU operands, f32 accumulation --------------------
    q = jnp.dot(xq_ref[0], wq_ref[...], preferred_element_type=f32) + bq_ref[...]
    k = jnp.dot(xk_ref[0], wk_ref[...], preferred_element_type=f32) + bk_ref[...]
    v = jnp.dot(xv_ref[0], wv_ref[...], preferred_element_type=f32) + bv_ref[...]

    # Fold 1/sqrt(d_k) into q once (instead of scaling (TQ,S) scores per head).
    q = (q * (1.0 / math.sqrt(d_k))).astype(bf16)
    k = k.astype(bf16)
    v = v.astype(bf16)

    keep = mask_ref[0] != 0            # (TQ, S) bool, hoisted out of head loop

    tq = out_ref.shape[1]
    d_model = out_ref.shape[2]
    acc = jnp.zeros((tq, d_model), f32)

    for h in range(num_heads):         # static unroll; heads are few
        lo = h * d_k
        qh = q[:, lo:lo + d_k]         # (TQ, d_k) bf16
        kh = k[:, lo:lo + d_k]         # (S,  d_k) bf16
        vh = v[:, lo:lo + d_k]         # (S,  d_k) bf16

        # scores = qh @ kh^T  (contract on d_k; no explicit transpose op)
        s = lax.dot_general(qh, kh, (((1,), (1,)), ((), ())),
                            preferred_element_type=f32)          # (TQ, S) f32
        s = jnp.where(keep, s, NEG_INF)

        # numerically stable softmax; elementwise math in f32 (v5e-friendly)
        m = jnp.max(s, axis=-1, keepdims=True)
        e = jnp.exp(s - m)
        p = e * pl.reciprocal(jnp.sum(e, axis=-1, keepdims=True), approx=True)

        # PV, then straight through the matching rows of W_o (no lane concat).
        oh = jnp.dot(p.astype(bf16), vh, preferred_element_type=f32)     # (TQ, d_k)
        acc = acc + jnp.dot(oh.astype(bf16), wo_ref[lo:lo + d_k, :],
                            preferred_element_type=f32)                  # (TQ, D)

    out_ref[0] = (acc + bo_ref[...]).astype(out_ref.dtype)


def multi_headed_attention(query, key, value, mask, params, *, num_heads,
                           block_q=128):
    """query/key/value: (B, S, D) float32; mask: (B, S, S), nonzero = attend."""
    B, S, D = query.shape
    assert D % num_heads == 0
    d_k = D // num_heads
    out_dtype = query.dtype

    if S % block_q != 0:               # toy / ragged sizes: one full-seq q tile
        block_q = S
    n_q = S // block_q

    wq, bq, wk, bk, wv, bv, wo, bo = params
    bf16 = jnp.bfloat16

    # bf16 activations & weights halve HBM->VMEM traffic; biases stay f32.
    qx = query.astype(bf16)
    kx = key.astype(bf16)
    vx = value.astype(bf16)
    mask_i8 = (mask != 0).astype(jnp.int8)

    kernel = functools.partial(_mha_kernel, num_heads=num_heads, d_k=d_k)

    q_spec = pl.BlockSpec((1, block_q, D), lambda b, qi: (b, qi, 0))
    kv_spec = pl.BlockSpec((1, S, D), lambda b, qi: (b, 0, 0))      # resident across qi
    mask_spec = pl.BlockSpec((1, block_q, S), lambda b, qi: (b, qi, 0))
    w_spec = pl.BlockSpec((D, D), lambda b, qi: (0, 0))             # weights resident
    b_spec = pl.BlockSpec((1, D), lambda b, qi: (0, 0))

    return pl.pallas_call(
        kernel,
        out_shape=jax.ShapeDtypeStruct((B, S, D), out_dtype),
        grid_spec=pltpu.PrefetchScalarGridSpec(
            num_scalar_prefetch=0,
            grid=(B, n_q),
            in_specs=[q_spec, kv_spec, kv_spec, mask_spec,
                      w_spec, b_spec, w_spec, b_spec,
                      w_spec, b_spec, w_spec, b_spec],
            out_specs=q_spec,
        ),
        compiler_params=pltpu.CompilerParams(
            dimension_semantics=("parallel", "parallel"),
            vmem_limit_bytes=32 * 1024 * 1024,
        ),
    )(qx, kx, vx, mask_i8,
      wq.astype(bf16), bq.reshape(1, D).astype(jnp.float32),
      wk.astype(bf16), bk.reshape(1, D).astype(jnp.float32),
      wv.astype(bf16), bv.reshape(1, D).astype(jnp.float32),
      wo.astype(bf16), bo.reshape(1, D).astype(jnp.float32))


def _reference(query, key, value, mask, params, *, num_heads):
    """Pure-JAX f32 reference reproducing the PyTorch forward (dropout = identity)."""
    B, S, D = query.shape
    d_k = D // num_heads
    wq, bq, wk, bk, wv, bv, wo, bo = params

    def proj(x, w, b):
        y = x @ w + b                                                   # (B, S, D)
        return y.reshape(B, S, num_heads, d_k).transpose(0, 2, 1, 3)    # (B,H,S,dk)

    q, k, v = proj(query, wq, bq), proj(key, wk, bk), proj(value, wv, bv)
    scores = jnp.einsum("bhqd,bhkd->bhqk", q, k) / math.sqrt(d_k)
    scores = jnp.where(mask[:, None, :, :] == 0.0, NEG_INF, scores)
    p = jax.nn.softmax(scores, axis=-1)
    x = jnp.einsum("bhqk,bhkd->bhqd", p, v)
    x = x.transpose(0, 2, 1, 3).reshape(B, S, D)
    return x @ wo + bo


if __name__ == "__main__":
    B, S, D, H = 2, 8, 32, 4

    key0 = jax.random.PRNGKey(0)
    ks = jax.random.split(key0, 12)
    bound = 1.0 / math.sqrt(D)   # torch.nn.Linear default init range

    def uni(k, shape):
        return jax.random.uniform(k, shape, jnp.float32, -bound, bound)

    params = (
        uni(ks[0], (D, D)), uni(ks[1], (D,)),   # Wq, bq
        uni(ks[2], (D, D)), uni(ks[3], (D,)),   # Wk, bk
        uni(ks[4], (D, D)), uni(ks[5], (D,)),   # Wv, bv
        uni(ks[6], (D, D)), uni(ks[7], (D,)),   # Wo, bo
    )

    query = jax.random.normal(ks[8], (B, S, D), jnp.float32)
    key_in = jax.random.normal(ks[9], (B, S, D), jnp.float32)
    value = jax.random.normal(ks[10], (B, S, D), jnp.float32)

    # causal mask (1 = attend, 0 = masked), shape (B, S, S)
    causal = jnp.tril(jnp.ones((S, S), jnp.float32))
    mask = jnp.broadcast_to(causal, (B, S, S))

    out = multi_headed_attention(query, key_in, value, mask, params, num_heads=H)
    out = jax.block_until_ready(out)

    ref = _reference(query, key_in, value, mask, params, num_heads=H)
    assert out.shape == (B, S, D)
    # bf16 MXU operands (f32 accumulation) + approx reciprocal => relaxed tolerance
    assert jnp.allclose(out, ref, atol=3e-2, rtol=3e-2), "mismatch vs reference"

    print("KERNEL_OK")
</pallas_src>

<mosaic_0001>
module attributes {stable_mosaic.version = 11 : i64} {
  func.func @_mha_kernel(%arg0: i32, %arg1: i32, %arg2: memref<1x8x32xbf16, #tpu.memory_space<vmem>>, %arg3: memref<1x8x32xbf16, #tpu.memory_space<vmem>>, %arg4: memref<1x8x32xbf16, #tpu.memory_space<vmem>>, %arg5: memref<1x8x8xi8, #tpu.memory_space<vmem>>, %arg6: memref<32x32xbf16, #tpu.memory_space<vmem>>, %arg7: memref<1x32xf32, #tpu.memory_space<vmem>>, %arg8: memref<32x32xbf16, #tpu.memory_space<vmem>>, %arg9: memref<1x32xf32, #tpu.memory_space<vmem>>, %arg10: memref<32x32xbf16, #tpu.memory_space<vmem>>, %arg11: memref<1x32xf32, #tpu.memory_space<vmem>>, %arg12: memref<32x32xbf16, #tpu.memory_space<vmem>>, %arg13: memref<1x32xf32, #tpu.memory_space<vmem>>, %arg14: memref<1x8x32xf32, #tpu.memory_space<vmem>>) attributes {dimension_semantics = [#tpu.dimension_semantics<parallel>, #tpu.dimension_semantics<parallel>], iteration_bounds = array<i64: 2, 1>, scalar_prefetch = 0 : i64, scratch_operands = 0 : i64, tpu.core_type = #tpu.core_type<tc>, window_params = [{transform_indices = @transform_0, window_bounds = array<i64: 1, 8, 32>}, {transform_indices = @transform_1, window_bounds = array<i64: 1, 8, 32>}, {transform_indices = @transform_2, window_bounds = array<i64: 1, 8, 32>}, {transform_indices = @transform_3, window_bounds = array<i64: 1, 8, 8>}, {pipeline_mode = #tpu.pipeline_mode<synchronous>, transform_indices = @transform_4, window_bounds = array<i64: 32, 32>}, {pipeline_mode = #tpu.pipeline_mode<synchronous>, transform_indices = @transform_5, window_bounds = array<i64: 1, 32>}, {pipeline_mode = #tpu.pipeline_mode<synchronous>, transform_indices = @transform_6, window_bounds = array<i64: 32, 32>}, {pipeline_mode = #tpu.pipeline_mode<synchronous>, transform_indices = @transform_7, window_bounds = array<i64: 1, 32>}, {pipeline_mode = #tpu.pipeline_mode<synchronous>, transform_indices = @transform_8, window_bounds = array<i64: 32, 32>}, {pipeline_mode = #tpu.pipeline_mode<synchronous>, transform_indices = @transform_9, window_bounds = array<i64: 1, 32>}, {pipeline_mode = #tpu.pipeline_mode<synchronous>, transform_indices = @transform_10, window_bounds = array<i64: 32, 32>}, {pipeline_mode = #tpu.pipeline_mode<synchronous>, transform_indices = @transform_11, window_bounds = array<i64: 1, 32>}, {transform_indices = @transform_12, window_bounds = array<i64: 1, 8, 32>}]} {
    %c0 = arith.constant 0 : index
    %c0_0 = arith.constant 0 : index
    %c0_1 = arith.constant 0 : index
    %0 = vector.load %arg2[%c0, %c0_0, %c0_1] : memref<1x8x32xbf16, #tpu.memory_space<vmem>>, vector<1x8x32xbf16>
    %1 = vector.shape_cast %0 : vector<1x8x32xbf16> to vector<8x32xbf16>
    %c0_2 = arith.constant 0 : index
    %c0_3 = arith.constant 0 : index
    %2 = vector.load %arg6[%c0_2, %c0_3] : memref<32x32xbf16, #tpu.memory_space<vmem>>, vector<32x32xbf16>
    %cst = arith.constant dense<0.000000e+00> : vector<8x32xf32>
    %3 = tpu.matmul %1, %2, %cst {dimension_numbers = #tpu.dot_dimension_numbers<[1], [0], [0], [1], [0, 0, 1, 1], [], []>} : vector<8x32xbf16>, vector<32x32xbf16>, vector<8x32xf32> -> vector<8x32xf32>
    %c0_4 = arith.constant 0 : index
    %c0_5 = arith.constant 0 : index
    %4 = vector.load %arg7[%c0_4, %c0_5] : memref<1x32xf32, #tpu.memory_space<vmem>>, vector<1x32xf32>
    %5 = vector.broadcast %4 : vector<1x32xf32> to vector<8x32xf32>
    %6 = arith.addf %3, %5 : vector<8x32xf32>
    %c0_6 = arith.constant 0 : index
    %c0_7 = arith.constant 0 : index
    %c0_8 = arith.constant 0 : index
    %7 = vector.load %arg3[%c0_6, %c0_7, %c0_8] : memref<1x8x32xbf16, #tpu.memory_space<vmem>>, vector<1x8x32xbf16>
    %8 = vector.shape_cast %7 : vector<1x8x32xbf16> to vector<8x32xbf16>
    %c0_9 = arith.constant 0 : index
    %c0_10 = arith.constant 0 : index
    %9 = vector.load %arg8[%c0_9, %c0_10] : memref<32x32xbf16, #tpu.memory_space<vmem>>, vector<32x32xbf16>
    %cst_11 = arith.constant dense<0.000000e+00> : vector<8x32xf32>
    %10 = tpu.matmul %8, %9, %cst_11 {dimension_numbers = #tpu.dot_dimension_numbers<[1], [0], [0], [1], [0, 0, 1, 1], [], []>} : vector<8x32xbf16>, vector<32x32xbf16>, vector<8x32xf32> -> vector<8x32xf32>
    %c0_12 = arith.constant 0 : index
    %c0_13 = arith.constant 0 : index
    %11 = vector.load %arg9[%c0_12, %c0_13] : memref<1x32xf32, #tpu.memory_space<vmem>>, vector<1x32xf32>
    %12 = vector.broadcast %11 : vector<1x32xf32> to vector<8x32xf32>
    %13 = arith.addf %10, %12 : vector<8x32xf32>
    %c0_14 = arith.constant 0 : index
    %c0_15 = arith.constant 0 : index
    %c0_16 = arith.constant 0 : index
    %14 = vector.load %arg4[%c0_14, %c0_15, %c0_16] : memref<1x8x32xbf16, #tpu.memory_space<vmem>>, vector<1x8x32xbf16>
    %15 = vector.shape_cast %14 : vector<1x8x32xbf16> to vector<8x32xbf16>
    %c0_17 = arith.constant 0 : index
    %c0_18 = arith.constant 0 : index
    %16 = vector.load %arg10[%c0_17, %c0_18] : memref<32x32xbf16, #tpu.memory_space<vmem>>, vector<32x32xbf16>
    %cst_19 = arith.constant dense<0.000000e+00> : vector<8x32xf32>
    %17 = tpu.matmul %15, %16, %cst_19 {dimension_numbers = #tpu.dot_dimension_numbers<[1], [0], [0], [1], [0, 0, 1, 1], [], []>} : vector<8x32xbf16>, vector<32x32xbf16>, vector<8x32xf32> -> vector<8x32xf32>
    %c0_20 = arith.constant 0 : index
    %c0_21 = arith.constant 0 : index
    %18 = vector.load %arg11[%c0_20, %c0_21] : memref<1x32xf32, #tpu.memory_space<vmem>>, vector<1x32xf32>
    %19 = vector.broadcast %18 : vector<1x32xf32> to vector<8x32xf32>
    %20 = arith.addf %17, %19 : vector<8x32xf32>
    %cst_22 = arith.constant 0.353553385 : f32
    %21 = vector.broadcast %cst_22 : f32 to vector<8x32xf32>
    %22 = arith.mulf %6, %21 : vector<8x32xf32>
    %23 = arith.truncf %22 : vector<8x32xf32> to vector<8x32xbf16>
    %24 = arith.truncf %13 : vector<8x32xf32> to vector<8x32xbf16>
    %25 = arith.truncf %20 : vector<8x32xf32> to vector<8x32xbf16>
    %c0_23 = arith.constant 0 : index
    %c0_24 = arith.constant 0 : index
    %c0_25 = arith.constant 0 : index
    %26 = vector.load %arg5[%c0_23, %c0_24, %c0_25] : memref<1x8x8xi8, #tpu.memory_space<vmem>>, vector<1x8x8xi8>
    %27 = vector.shape_cast %26 : vector<1x8x8xi8> to vector<8x8xi8>
    %c0_i8 = arith.constant 0 : i8
    %28 = vector.broadcast %c0_i8 : i8 to vector<8x8xi8>
    %29 = arith.cmpi ne, %27, %28 : vector<8x8xi8>
    %cst_26 = arith.constant 0.000000e+00 : f32
    %30 = vector.broadcast %cst_26 : f32 to vector<8x32xf32>
    %31 = vector.extract_strided_slice %23 {offsets = [0, 0], sizes = [8, 8], strides = [1, 1]} : vector<8x32xbf16> to vector<8x8xbf16>
    %32 = vector.extract_strided_slice %24 {offsets = [0, 0], sizes = [8, 8], strides = [1, 1]} : vector<8x32xbf16> to vector<8x8xbf16>
    %33 = vector.extract_strided_slice %25 {offsets = [0, 0], sizes = [8, 8], strides = [1, 1]} : vector<8x32xbf16> to vector<8x8xbf16>
    %cst_27 = arith.constant dense<0.000000e+00> : vector<8x8xf32>
    %34 = tpu.matmul %31, %32, %cst_27 {dimension_numbers = #tpu.dot_dimension_numbers<[1], [1], [0], [0], [0, 0, 1, 0], [], []>} : vector<8x8xbf16>, vector<8x8xbf16>, vector<8x8xf32> -> vector<8x8xf32>
    %cst_28 = arith.constant -1.000000e+09 : f32
    %35 = vector.broadcast %cst_28 : f32 to vector<8x8xf32>
    %36 = arith.select %29, %34, %35 : vector<8x8xi1>, vector<8x8xf32>
    %cst_29 = arith.constant dense<0xFF800000> : vector<8xf32>
    %37 = vector.multi_reduction <maximumf>, %36, %cst_29 [1] : vector<8x8xf32> to vector<8xf32>
    %38 = vector.shape_cast %37 : vector<8xf32> to vector<8x1xf32>
    %39 = vector.broadcast %38 : vector<8x1xf32> to vector<8x8xf32>
    %40 = arith.subf %36, %39 : vector<8x8xf32>
    %41 = math.exp %40 : vector<8x8xf32>
    %cst_30 = arith.constant dense<0.000000e+00> : vector<8xf32>
    %42 = vector.multi_reduction <add>, %41, %cst_30 [1] : vector<8x8xf32> to vector<8xf32>
    %43 = vector.shape_cast %42 : vector<8xf32> to vector<8x1xf32>
    %44 = tpu.reciprocal %43 {approx = true} : vector<8x1xf32> -> vector<8x1xf32>
    %45 = vector.broadcast %44 : vector<8x1xf32> to vector<8x8xf32>
    %46 = arith.mulf %41, %45 : vector<8x8xf32>
    %47 = arith.truncf %46 : vector<8x8xf32> to vector<8x8xbf16>
    %cst_31 = arith.constant dense<0.000000e+00> : vector<8x8xf32>
    %48 = tpu.matmul %47, %33, %cst_31 {dimension_numbers = #tpu.dot_dimension_numbers<[1], [0], [0], [1], [0, 0, 1, 1], [], []>} : vector<8x8xbf16>, vector<8x8xbf16>, vector<8x8xf32> -> vector<8x8xf32>
    %49 = arith.truncf %48 : vector<8x8xf32> to vector<8x8xbf16>
    %c0_32 = arith.constant 0 : index
    %c0_33 = arith.constant 0 : index
    %50 = vector.load %arg12[%c0_32, %c0_33] : memref<32x32xbf16, #tpu.memory_space<vmem>>, vector<8x32xbf16>
    %cst_34 = arith.constant dense<0.000000e+00> : vector<8x32xf32>
    %51 = tpu.matmul %49, %50, %cst_34 {dimension_numbers = #tpu.dot_dimension_numbers<[1], [0], [0], [1], [0, 0, 1, 1], [], []>} : vector<8x8xbf16>, vector<8x32xbf16>, vector<8x32xf32> -> vector<8x32xf32>
    %52 = arith.addf %30, %51 : vector<8x32xf32>
    %53 = vector.extract_strided_slice %23 {offsets = [0, 8], sizes = [8, 8], strides = [1, 1]} : vector<8x32xbf16> to vector<8x8xbf16>
    %54 = vector.extract_strided_slice %24 {offsets = [0, 8], sizes = [8, 8], strides = [1, 1]} : vector<8x32xbf16> to vector<8x8xbf16>
    %55 = vector.extract_strided_slice %25 {offsets = [0, 8], sizes = [8, 8], strides = [1, 1]} : vector<8x32xbf16> to vector<8x8xbf16>
    %cst_35 = arith.constant dense<0.000000e+00> : vector<8x8xf32>
    %56 = tpu.matmul %53, %54, %cst_35 {dimension_numbers = #tpu.dot_dimension_numbers<[1], [1], [0], [0], [0, 0, 1, 0], [], []>} : vector<8x8xbf16>, vector<8x8xbf16>, vector<8x8xf32> -> vector<8x8xf32>
    %cst_36 = arith.constant -1.000000e+09 : f32
    %57 = vector.broadcast %cst_36 : f32 to vector<8x8xf32>
    %58 = arith.select %29, %56, %57 : vector<8x8xi1>, vector<8x8xf32>
    %cst_37 = arith.constant dense<0xFF800000> : vector<8xf32>
    %59 = vector.multi_reduction <maximumf>, %58, %cst_37 [1] : vector<8x8xf32> to vector<8xf32>
    %60 = vector.shape_cast %59 : vector<8xf32> to vector<8x1xf32>
    %61 = vector.broadcast %60 : vector<8x1xf32> to vector<8x8xf32>
    %62 = arith.subf %58, %61 : vector<8x8xf32>
    %63 = math.exp %62 : vector<8x8xf32>
    %cst_38 = arith.constant dense<0.000000e+00> : vector<8xf32>
    %64 = vector.multi_reduction <add>, %63, %cst_38 [1] : vector<8x8xf32> to vector<8xf32>
    %65 = vector.shape_cast %64 : vector<8xf32> to vector<8x1xf32>
    %66 = tpu.reciprocal %65 {approx = true} : vector<8x1xf32> -> vector<8x1xf32>
    %67 = vector.broadcast %66 : vector<8x1xf32> to vector<8x8xf32>
    %68 = arith.mulf %63, %67 : vector<8x8xf32>
    %69 = arith.truncf %68 : vector<8x8xf32> to vector<8x8xbf16>
    %cst_39 = arith.constant dense<0.000000e+00> : vector<8x8xf32>
    %70 = tpu.matmul %69, %55, %cst_39 {dimension_numbers = #tpu.dot_dimension_numbers<[1], [0], [0], [1], [0, 0, 1, 1], [], []>} : vector<8x8xbf16>, vector<8x8xbf16>, vector<8x8xf32> -> vector<8x8xf32>
    %71 = arith.truncf %70 : vector<8x8xf32> to vector<8x8xbf16>
    %c8 = arith.constant 8 : index
    %c0_40 = arith.constant 0 : index
    %72 = vector.load %arg12[%c8, %c0_40] : memref<32x32xbf16, #tpu.memory_space<vmem>>, vector<8x32xbf16>
    %cst_41 = arith.constant dense<0.000000e+00> : vector<8x32xf32>
    %73 = tpu.matmul %71, %72, %cst_41 {dimension_numbers = #tpu.dot_dimension_numbers<[1], [0], [0], [1], [0, 0, 1, 1], [], []>} : vector<8x8xbf16>, vector<8x32xbf16>, vector<8x32xf32> -> vector<8x32xf32>
    %74 = arith.addf %52, %73 : vector<8x32xf32>
    %75 = vector.extract_strided_slice %23 {offsets = [0, 16], sizes = [8, 8], strides = [1, 1]} : vector<8x32xbf16> to vector<8x8xbf16>
    %76 = vector.extract_strided_slice %24 {offsets = [0, 16], sizes = [8, 8], strides = [1, 1]} : vector<8x32xbf16> to vector<8x8xbf16>
    %77 = vector.extract_strided_slice %25 {offsets = [0, 16], sizes = [8, 8], strides = [1, 1]} : vector<8x32xbf16> to vector<8x8xbf16>
    %cst_42 = arith.constant dense<0.000000e+00> : vector<8x8xf32>
    %78 = tpu.matmul %75, %76, %cst_42 {dimension_numbers = #tpu.dot_dimension_numbers<[1], [1], [0], [0], [0, 0, 1, 0], [], []>} : vector<8x8xbf16>, vector<8x8xbf16>, vector<8x8xf32> -> vector<8x8xf32>
    %cst_43 = arith.constant -1.000000e+09 : f32
    %79 = vector.broadcast %cst_43 : f32 to vector<8x8xf32>
    %80 = arith.select %29, %78, %79 : vector<8x8xi1>, vector<8x8xf32>
    %cst_44 = arith.constant dense<0xFF800000> : vector<8xf32>
    %81 = vector.multi_reduction <maximumf>, %80, %cst_44 [1] : vector<8x8xf32> to vector<8xf32>
    %82 = vector.shape_cast %81 : vector<8xf32> to vector<8x1xf32>
    %83 = vector.broadcast %82 : vector<8x1xf32> to vector<8x8xf32>
    %84 = arith.subf %80, %83 : vector<8x8xf32>
    %85 = math.exp %84 : vector<8x8xf32>
    %cst_45 = arith.constant dense<0.000000e+00> : vector<8xf32>
    %86 = vector.multi_reduction <add>, %85, %cst_45 [1] : vector<8x8xf32> to vector<8xf32>
    %87 = vector.shape_cast %86 : vector<8xf32> to vector<8x1xf32>
    %88 = tpu.reciprocal %87 {approx = true} : vector<8x1xf32> -> vector<8x1xf32>
    %89 = vector.broadcast %88 : vector<8x1xf32> to vector<8x8xf32>
    %90 = arith.mulf %85, %89 : vector<8x8xf32>
    %91 = arith.truncf %90 : vector<8x8xf32> to vector<8x8xbf16>
    %cst_46 = arith.constant dense<0.000000e+00> : vector<8x8xf32>
    %92 = tpu.matmul %91, %77, %cst_46 {dimension_numbers = #tpu.dot_dimension_numbers<[1], [0], [0], [1], [0, 0, 1, 1], [], []>} : vector<8x8xbf16>, vector<8x8xbf16>, vector<8x8xf32> -> vector<8x8xf32>
    %93 = arith.truncf %92 : vector<8x8xf32> to vector<8x8xbf16>
    %c16 = arith.constant 16 : index
    %c0_47 = arith.constant 0 : index
    %94 = vector.load %arg12[%c16, %c0_47] : memref<32x32xbf16, #tpu.memory_space<vmem>>, vector<8x32xbf16>
    %cst_48 = arith.constant dense<0.000000e+00> : vector<8x32xf32>
    %95 = tpu.matmul %93, %94, %cst_48 {dimension_numbers = #tpu.dot_dimension_numbers<[1], [0], [0], [1], [0, 0, 1, 1], [], []>} : vector<8x8xbf16>, vector<8x32xbf16>, vector<8x32xf32> -> vector<8x32xf32>
    %96 = arith.addf %74, %95 : vector<8x32xf32>
    %97 = vector.extract_strided_slice %23 {offsets = [0, 24], sizes = [8, 8], strides = [1, 1]} : vector<8x32xbf16> to vector<8x8xbf16>
    %98 = vector.extract_strided_slice %24 {offsets = [0, 24], sizes = [8, 8], strides = [1, 1]} : vector<8x32xbf16> to vector<8x8xbf16>
    %99 = vector.extract_strided_slice %25 {offsets = [0, 24], sizes = [8, 8], strides = [1, 1]} : vector<8x32xbf16> to vector<8x8xbf16>
    %cst_49 = arith.constant dense<0.000000e+00> : vector<8x8xf32>
    %100 = tpu.matmul %97, %98, %cst_49 {dimension_numbers = #tpu.dot_dimension_numbers<[1], [1], [0], [0], [0, 0, 1, 0], [], []>} : vector<8x8xbf16>, vector<8x8xbf16>, vector<8x8xf32> -> vector<8x8xf32>
    %cst_50 = arith.constant -1.000000e+09 : f32
    %101 = vector.broadcast %cst_50 : f32 to vector<8x8xf32>
    %102 = arith.select %29, %100, %101 : vector<8x8xi1>, vector<8x8xf32>
    %cst_51 = arith.constant dense<0xFF800000> : vector<8xf32>
    %103 = vector.multi_reduction <maximumf>, %102, %cst_51 [1] : vector<8x8xf32> to vector<8xf32>
    %104 = vector.shape_cast %103 : vector<8xf32> to vector<8x1xf32>
    %105 = vector.broadcast %104 : vector<8x1xf32> to vector<8x8xf32>
    %106 = arith.subf %102, %105 : vector<8x8xf32>
    %107 = math.exp %106 : vector<8x8xf32>
    %cst_52 = arith.constant dense<0.000000e+00> : vector<8xf32>
    %108 = vector.multi_reduction <add>, %107, %cst_52 [1] : vector<8x8xf32> to vector<8xf32>
    %109 = vector.shape_cast %108 : vector<8xf32> to vector<8x1xf32>
    %110 = tpu.reciprocal %109 {approx = true} : vector<8x1xf32> -> vector<8x1xf32>
    %111 = vector.broadcast %110 : vector<8x1xf32> to vector<8x8xf32>
    %112 = arith.mulf %107, %111 : vector<8x8xf32>
    %113 = arith.truncf %112 : vector<8x8xf32> to vector<8x8xbf16>
    %cst_53 = arith.constant dense<0.000000e+00> : vector<8x8xf32>
    %114 = tpu.matmul %113, %99, %cst_53 {dimension_numbers = #tpu.dot_dimension_numbers<[1], [0], [0], [1], [0, 0, 1, 1], [], []>} : vector<8x8xbf16>, vector<8x8xbf16>, vector<8x8xf32> -> vector<8x8xf32>
    %115 = arith.truncf %114 : vector<8x8xf32> to vector<8x8xbf16>
    %c24 = arith.constant 24 : index
    %c0_54 = arith.constant 0 : index
    %116 = vector.load %arg12[%c24, %c0_54] : memref<32x32xbf16, #tpu.memory_space<vmem>>, vector<8x32xbf16>
    %cst_55 = arith.constant dense<0.000000e+00> : vector<8x32xf32>
    %117 = tpu.matmul %115, %116, %cst_55 {dimension_numbers = #tpu.dot_dimension_numbers<[1], [0], [0], [1], [0, 0, 1, 1], [], []>} : vector<8x8xbf16>, vector<8x32xbf16>, vector<8x32xf32> -> vector<8x32xf32>
    %118 = arith.addf %96, %117 : vector<8x32xf32>
    %c0_56 = arith.constant 0 : index
    %c0_57 = arith.constant 0 : index
    %119 = vector.load %arg13[%c0_56, %c0_57] : memref<1x32xf32, #tpu.memory_space<vmem>>, vector<1x32xf32>
    %120 = vector.broadcast %119 : vector<1x32xf32> to vector<8x32xf32>
    %121 = arith.addf %118, %120 : vector<8x32xf32>
    %c0_58 = arith.constant 0 : index
    %c0_59 = arith.constant 0 : index
    %c0_60 = arith.constant 0 : index
    %122 = vector.load %arg14[%c0_58, %c0_59, %c0_60] : memref<1x8x32xf32, #tpu.memory_space<vmem>>, vector<1x8x32xf32>
    %123 = vector.shape_cast %122 : vector<1x8x32xf32> to vector<8x32xf32>
    %124 = vector.shape_cast %121 : vector<8x32xf32> to vector<1x8x32xf32>
    tpu.vector_store %arg14[%c0_58, %c0_59, %c0_60], %124 {strides = array<i32>} : memref<1x8x32xf32, #tpu.memory_space<vmem>>, vector<1x8x32xf32>,
    return
  }
  func.func @transform_0(%arg0: i32, %arg1: i32) -> (i32, i32, i32) {
    %c0_i32 = arith.constant 0 : i32
    %c0_i32_0 = arith.constant 0 : i32
    return %arg0, %arg1, %c0_i32 : i32, i32, i32
  }
  func.func @transform_1(%arg0: i32, %arg1: i32) -> (i32, i32, i32) {
    %c0_i32 = arith.constant 0 : i32
    %c0_i32_0 = arith.constant 0 : i32
    %c0_i32_1 = arith.constant 0 : i32
    return %arg0, %c0_i32, %c0_i32_0 : i32, i32, i32
  }
  func.func @transform_2(%arg0: i32, %arg1: i32) -> (i32, i32, i32) {
    %c0_i32 = arith.constant 0 : i32
    %c0_i32_0 = arith.constant 0 : i32
    %c0_i32_1 = arith.constant 0 : i32
    return %arg0, %c0_i32, %c0_i32_0 : i32, i32, i32
  }
  func.func @transform_3(%arg0: i32, %arg1: i32) -> (i32, i32, i32) {
    %c0_i32 = arith.constant 0 : i32
    %c0_i32_0 = arith.constant 0 : i32
    return %arg0, %arg1, %c0_i32 : i32, i32, i32
  }
  func.func @transform_4(%arg0: i32, %arg1: i32) -> (i32, i32) {
    %c0_i32 = arith.constant 0 : i32
    %c0_i32_0 = arith.constant 0 : i32
    %c0_i32_1 = arith.constant 0 : i32
    return %c0_i32, %c0_i32_0 : i32, i32
  }
  func.func @transform_5(%arg0: i32, %arg1: i32) -> (i32, i32) {
    %c0_i32 = arith.constant 0 : i32
    %c0_i32_0 = arith.constant 0 : i32
    %c0_i32_1 = arith.constant 0 : i32
    return %c0_i32, %c0_i32_0 : i32, i32
  }
  func.func @transform_6(%arg0: i32, %arg1: i32) -> (i32, i32) {
    %c0_i32 = arith.constant 0 : i32
    %c0_i32_0 = arith.constant 0 : i32
    %c0_i32_1 = arith.constant 0 : i32
    return %c0_i32, %c0_i32_0 : i32, i32
  }
  func.func @transform_7(%arg0: i32, %arg1: i32) -> (i32, i32) {
    %c0_i32 = arith.constant 0 : i32
    %c0_i32_0 = arith.constant 0 : i32
    %c0_i32_1 = arith.constant 0 : i32
    return %c0_i32, %c0_i32_0 : i32, i32
  }
  func.func @transform_8(%arg0: i32, %arg1: i32) -> (i32, i32) {
    %c0_i32 = arith.constant 0 : i32
    %c0_i32_0 = arith.constant 0 : i32
    %c0_i32_1 = arith.constant 0 : i32
    return %c0_i32, %c0_i32_0 : i32, i32
  }
  func.func @transform_9(%arg0: i32, %arg1: i32) -> (i32, i32) {
    %c0_i32 = arith.constant 0 : i32
    %c0_i32_0 = arith.constant 0 : i32
    %c0_i32_1 = arith.constant 0 : i32
    return %c0_i32, %c0_i32_0 : i32, i32
  }
  func.func @transform_10(%arg0: i32, %arg1: i32) -> (i32, i32) {
    %c0_i32 = arith.constant 0 : i32
    %c0_i32_0 = arith.constant 0 : i32
    %c0_i32_1 = arith.constant 0 : i32
    return %c0_i32, %c0_i32_0 : i32, i32
  }
  func.func @transform_11(%arg0: i32, %arg1: i32) -> (i32, i32) {
    %c0_i32 = arith.constant 0 : i32
    %c0_i32_0 = arith.constant 0 : i32
    %c0_i32_1 = arith.constant 0 : i32
    return %c0_i32, %c0_i32_0 : i32, i32
  }
  func.func @transform_12(%arg0: i32, %arg1: i32) -> (i32, i32, i32) {
    %c0_i32 = arith.constant 0 : i32
    %c0_i32_0 = arith.constant 0 : i32
    return %arg0, %arg1, %c0_i32 : i32, i32, i32
  }
}

</mosaic_0001>

<bundles_post_ra>
// kernel: tpu_custom_call.1
= control target key start
LH: loop header
LB: loop body
LE: loop exit
PB: predicated region body
PF: predicated region fallthrough
CT: control target
= control target key end

     0   :  { %s2893_s0 = inlined_call_operand.hbm [shape: bf16[2,8,32], index: 0, kind: input, shape index: {}]   ;;  %s2894_s1 = inlined_call_operand.hbm [shape: bf16[2,8,32], index: 1, kind: input, shape index: {}]   ;;  %s2895_s2 = inlined_call_operand.hbm [shape: bf16[2,8,32], index: 2, kind: input, shape index: {}]   ;;  %s2896_s3 = inlined_call_operand.hbm [shape: s8[2,8,8], index: 3, kind: input, shape index: {}]   ;;  %s2897_s4 = inlined_call_operand.hbm [shape: bf16[32,32], index: 4, kind: input, shape index: {}]   ;;  %s2898_s5 = inlined_call_operand.vmem [shape: f32[1,32], index: 5, kind: input, shape index: {}]   ;;  %s2899_s6 = inlined_call_operand.vmem [shape: bf16[32,32], index: 6, kind: input, shape index: {}]   ;;  %s2900_s7 = inlined_call_operand.vmem [shape: f32[1,32], index: 7, kind: input, shape index: {}]   ;;  %s2901_s8 = inlined_call_operand.hbm [shape: bf16[32,32], index: 8, kind: input, shape index: {}]   ;;  %s2902_s9 = inlined_call_operand.hbm [shape: f32[1,32], index: 9, kind: input, shape index: {}]   ;;  %s2903_s10 = inlined_call_operand.vmem [shape: bf16[32,32], index: 10, kind: input, shape index: {}]   ;;  %s2904_s11 = inlined_call_operand.vmem [shape: f32[1,32], index: 11, kind: input, shape index: {}]   ;;  %s2905_s12 = inlined_call_operand.hbm [shape: f32[2,8,32], index: 12, kind: output, shape index: {}]  }
   0x1   :  { %2924 = sst [smem:[#allocation28_spill]] %s2894_s1 }
   0x2   :  { %2925 = sst [smem:[#allocation29_spill]] %s2897_s4 }
   0x3   :  { %2926 = sst [smem:[#allocation30_spill]] %s2898_s5 }
   0x4   :  { %2927 = sst [smem:[#allocation31_spill]] %s2900_s7 }
   0x5   :  { %2928 = sst [smem:[#allocation32_spill]] %s2901_s8 }
   0x6   :  { %2929 = sst [smem:[#allocation33_spill]] %s2903_s10 }
   0x7   :  { %2930 = sst [smem:[#allocation34_spill]] %s2904_s11 }
   0x8   :  { %2931 = sst [smem:[#allocation35_spill]] %s2905_s12 }
   0x9   :  { %17 = vsyncpa [#allocation3], 0 }
   0xa   :  { %19 = vsyncpa [#allocation3 + $0x1], 0 }
   0xb   :  { %20 = vsyncpa [#allocation6], 0 }
   0xc   :  { %22 = vsyncpa [#allocation6 + $0x1], 0 }
   0xd   :  { %23 = vsyncpa [#allocation9], 0 }
   0xe   :  { %25 = vsyncpa [#allocation9 + $0x1], 0 }
   0xf   :  { %26 = vsyncpa [#allocation12], 0 }
  0x10   :  { %27 = vsyncpa [#allocation4], 0 }
  0x11   :  { %29 = vsyncpa [#allocation4 + $0x1], 0  ;;  %s2353_s21 = smov 0   ;;  %s2355_s22 = smov 0  }
  0x12   :  { %s2357_s23 = smov 0   ;;  %s2359_s24 = smov 0  }
  0x13   :  { %s2361_s25 = smov 0   ;;  %s2363_s26 = smov 0  }
  0x14 LB: > { %2932 = sst [smem:[#allocation21_spill]] %s2250_s21  ;;  %s2384_s27 = sadd.s32 4294967295, %s2270_s26   ;;  %s2270_s26 = sphi %s2363_s26, %s35_s26   ;;  %s2266_s25 = sphi %s2361_s25, %s2984_s25   ;;  %s2262_s24 = sphi %s2359_s24, %s2983_s24   ;;  %s2258_s23 = sphi %s2357_s23, %s2979_s23   ;;  %s2254_s22 = sphi %s2355_s22, %s2982_s22   ;;  %s2250_s21 = sphi %s2353_s21, %s2981_s21  }
  0x15   : > { %2933 = sst [smem:[#allocation22_spill]] %s2258_s23  ;;  %s1649_s28 = sadd.s32 4294967294, %s2270_s26  }
  0x16   : > { %2934 = sst [smem:[#allocation23_spill]] %s2262_s24  ;;  %p69_p0 = scmp.ne.s32.totalorder %s2254_s22, %s2250_s21 }
  0x17   : > { %p2909_p1 = scmp.eq.s32.totalorder %s2384_s27, 0  ;;  %p349_p3 = scmp.eq.s32.totalorder %s1649_s28, 1 }
  0x18   : > { %p1650_p5 = scmp.ge.s32.totalorder %s2270_s26, 1  ;;  %p356_p7 = scmp.lt.s32.totalorder %s2270_s26, 3 }
  0x19   : > { %p2393_p4 = por %p2909_p1, %p69_p0  ;;  %p2398_p6 = por %p349_p3, %p69_p0 }
  0x1a   : > { %p2403_p8 = pnand %p1650_p5, %p356_p7  ;;  %s2272_s14 = smov [#allocation10]  }
  0x1b   : > { %s2935_s29 = scalar_select %p2393_p4, 1, 0 }
  0x1c   : > { %s2936_s30 = scalar_select %p2398_p6, 1, 0 }
  0x1d   : > { %s2938_s13 = scalar_select %p2403_p8, 1, 0 }
  0x1e   : > { %2937 = sst [smem:[#allocation24_spill]] %s2936_s30  ;;  %s368_s15 = sshll.u32 %s2272_s14, 4  ;;  %s2407_s15 = int_to_ptr.vmem [resolvable:$true] %s368_s15 }
  0x1f   : > { %p1852_p9 = pneg %p2403_p8  ;;  %s2273_s17 = smov [#allocation11]  }
  0x20   : > { %s390_s18 = sshll.u32 %s2273_s17, 4  ;;  %s2940_s4 = sld [smem:[#allocation29_spill]]  ;;  %s2418_s18 = int_to_ptr.vmem [resolvable:$true] %s390_s18 }
  0x21   : > { %p2414_p11 = pnand %p1852_p9, %p2909_p1 }
  0x23   : > { %s2939_s16 = scalar_select %p2414_p11, 1, 0 }
  0x24   : > { %p2428_p13 = pneg %p2414_p11 }
  0x26   : > { %s1968_s28 = scalar_lea.hbm %s2940_s4, 256 }
  0x27   : > { %p1969_p12 = scmp.ne.s32.totalorder %s2940_s4, %s1968_s28  ;;  %p1975_p5 = scmp.lt.u32.totalorder %s1968_s28, %s2940_s4 }
  0x28   : > { %s2941_s21 = scalar_select %p2428_p13, 1, 0 }
  0x29   : > { %p1971_p0 = pnand %p2428_p13, %p1969_p12 }
  0x2b   : > { %p1972_p3 = pneg %p1971_p0 }
  0x2d   : > { %p1977_p7 = pnand %p1975_p5, %p1972_p3 }
  0x2f   : > { %1980 = shalt.err (!%p1977_p7)
}
  0x30   : > { %s1981_s30 = scalar_lea.vmem %s2407_s15, 256  ;;  %p1989_p2 = scmp.lt.s32.totalorder %s2407_s15, %s2407_s15 }
  0x31   : > { %p1982_p9 = scmp.ne.s32.totalorder %s2407_s15, %s1981_s30  ;;  %p1990_p6 = scmp.lt.s32.totalorder %s1981_s30, %s1981_s30 }
  0x33   : > { %p1984_p10 = pnand %p1982_p9, %p2428_p13  ;;  %p1991_p12 = por %p1990_p6, %p1989_p2 }
  0x35   : > { %p1985_p1 = pneg %p1984_p10 }
  0x37   : > { %p1992_p0 = pnand %p1991_p12, %p1985_p1 }
  0x39   : > { %1995 = shalt.err (!%p1992_p0)
}
  0x3a   : > { %s2274_s19 = smov 64   ;;  %s2275_s12 = smov 4  }
  0x3b   : > { %1855 = dma.hbm_to_vmem [thread:$0]  (!%p2414_p11), %s2940_s4, 256, %s2407_s15, [#allocation9], %s2274_s19, %s2274_s19, %s2275_s12  }
  0x3c   : > { %s2942_s8 = sld [smem:[#allocation32_spill]] }
  0x42   : > { %s1996_s11 = scalar_lea.hbm %s2942_s8, 256 }
  0x43   : > { %p1997_p2 = scmp.ne.s32.totalorder %s2942_s8, %s1996_s11  ;;  %p2003_p10 = scmp.lt.u32.totalorder %s1996_s11, %s2942_s8 }
  0x45   : > { %p1999_p1 = pnand %p1997_p2, %p2428_p13 }
  0x47   : > { %p2000_p6 = pneg %p1999_p1 }
  0x49   : > { %p2005_p3 = pnand %p2003_p10, %p2000_p6 }
  0x4b   : > { %2008 = shalt.err (!%p2005_p3)
}
  0x4c   : > { %s2009_s15 = scalar_lea.vmem %s2418_s18, 256  ;;  %p2017_p12 = scmp.lt.s32.totalorder %s2418_s18, %s2418_s18 }
  0x4d   : > { %p2010_p5 = scmp.ne.s32.totalorder %s2418_s18, %s2009_s15  ;;  %p2018_p0 = scmp.lt.s32.totalorder %s2009_s15, %s2009_s15 }
  0x4f   : > { %p2012_p7 = pnand %p2010_p5, %p2428_p13  ;;  %p2019_p2 = por %p2018_p0, %p2017_p12 }
  0x51   : > { %p2013_p9 = pneg %p2012_p7 }
  0x53   : > { %p2020_p1 = pnand %p2019_p2, %p2013_p9 }
  0x55   : > { %2023 = shalt.err (!%p2020_p1)
}
  0x56   : > { %1858 = dma.hbm_to_vmem [thread:$0]  (!%p2414_p11), %s2942_s8, 256, %s2418_s18, [#allocation12], %s2274_s19, %s2274_s19, %s2275_s12  }
  0x57   : > { %s47_s11 = sadd.s32 1, %s2266_s25  ;;  %s56_s24 = sadd.s32 1, %s2258_s23 }
  0x58   : > { %p49_p6 = scmp.ge.s32.totalorder %s47_s11, 2  ;;  %p63_p10 = scmp.ne.s32.totalorder %s2258_s23, %s2254_s22 }
  0x59   : > { %p64_p3 = scmp.eq.s32.totalorder %s2270_s26, 0  ;;  %p1882_p5 = scmp.lt.s32.totalorder %s2270_s26, 2 }
  0x5a   : > { %s2986_s11 = smov (%p49_p6, %s47_s11), 0  ;;  %p2944_p9 = scmp.eq.s32.totalorder %s2384_s27, 1 }
  0x5b   : > { %2943 = sst [smem:[#allocation25_spill]] %s2986_s11  ;;  %p65_p7 = por %p64_p3, %p63_p10 }
  0x5c   : > { %p2482_p12 = por %p2944_p9, %p63_p10  ;;  %s51_s28 = ssub.s32 %s2266_s25, %s2986_s11 }
  0x5d   : > { %s2489_s18 = sand.u32 1, %s2258_s23   ;;  %p54_p0 = scmp.eq.s32.totalorder %s51_s28, 0 }
  0x5e   : > { %s2945_s20 = scalar_select %p2482_p12, 1, 0 }
  0x5f   : > { %s2492_s19 = sshll.u32 %s2489_s18, 2  ;;  %s2495_s12 = sshll.u32 %s2266_s25, 6 }
  0x60   : > { %2946 = sst [smem:[#allocation26_spill]] %s2945_s20  ;;  %p2497_p2 = pnand %p1882_p5, %p65_p7 }
  0x61   : > { %s2502_s17 = scalar_select %p54_p0, %s2258_s23, %s56_s24  }
  0x62   : > { %s2947_s14 = scalar_select %p2497_p2, 1, 0 }
  0x63   : > { %2948 = sst [smem:[#allocation27_spill]] %s2502_s17  ;;  %s2915_s30 = sand.u32 1, %s2270_s26  }
  0x64   : > { %s2949_s1 = sld [smem:[#allocation28_spill]]  ;;  %s444_s28 = scalar_lea.vmem [#allocation5], %s2492_s19 }
  0x65   : > { %s451_s4 = sshll.u32 %s444_s28, 4  ;;  %s2516_s8 = scalar_lea.sflag [#allocation6], %s2915_s30  ;;  %s2512_s4 = int_to_ptr.vmem [resolvable:$true] %s451_s4 }
  0x66   : > { %p2522_p6 = pneg %p2497_p2 }
  0x6a   : > { %s2509_s10 = scalar_lea.hbm %s2949_s1, %s2495_s12  ;;  %s2029_s28 = scalar_lea.hbm %s2949_s1, 128 }
  0x6b   : > { %s2024_s11 = scalar_lea.hbm %s2509_s10, 64  ;;  %p2030_p5 = scmp.lt.u32.totalorder %s2509_s10, %s2949_s1 }
  0x6c   : > { %p2025_p1 = scmp.ne.s32.totalorder %s2509_s10, %s2024_s11  ;;  %p2031_p7 = scmp.lt.u32.totalorder %s2029_s28, %s2024_s11 }
  0x6d   : > { %p2033_p0 = scmp.lt.u32.totalorder %s2024_s11, %s2509_s10 }
  0x6e   : > { %p2027_p10 = pnand %p2522_p6, %p2025_p1  ;;  %p2032_p9 = por %p2031_p7, %p2030_p5 }
  0x70   : > { %p2028_p3 = pneg %p2027_p10  ;;  %p2034_p12 = por %p2033_p0, %p2032_p9 }
  0x72   : > { %p2035_p4 = pnand %p2034_p12, %p2028_p3 }
  0x74   : > { %2038 = shalt.err (!%p2035_p4)
}
  0x75   : > { %s2039_s30 = scalar_lea.vmem %s2512_s4, 64  ;;  %s2276_s15 = smov [#allocation5]  }
  0x76   : > { %p2040_p1 = scmp.ne.s32.totalorder %s2512_s4, %s2039_s30  ;;  %s2044_s5 = sshll.u32 %s2276_s15, 4  ;;  %s2045_s5 = int_to_ptr.vmem [resolvable:$false] %s2044_s5 }
  0x77   : > { %s2046_s23 = scalar_lea.vmem %s2045_s5, 128  ;;  %p2047_p11 = scmp.lt.s32.totalorder %s2512_s4, %s2045_s5 }
  0x78   : > { %p2042_p10 = pnand %p2040_p1, %p2522_p6  ;;  %p2048_p13 = scmp.lt.s32.totalorder %s2046_s23, %s2039_s30 }
  0x7a   : > { %p2043_p8 = pneg %p2042_p10  ;;  %p2049_p5 = por %p2048_p13, %p2047_p11 }
  0x7c   : > { %p2050_p7 = pnand %p2049_p5, %p2043_p8 }
  0x7e   : > { %2053 = shalt.err (!%p2050_p7)
}
  0x7f   : > { %1868 = dma.hbm_to_vmem [thread:$0]  (!%p2497_p2), %s2509_s10, 64, %s2512_s4, %s2516_s8  }
  0x80   : > { %s2277_s11 = smov [#allocation13]   ;;  %s2550_s1 = scalar_lea.hbm %s2893_s0, %s2495_s12 }
  0x81   : > { %s404_s17 = sshll.u32 %s2277_s11, 4  ;;  %s2054_s23 = scalar_lea.hbm %s2902_s9, 16  ;;  %s405_s17 = int_to_ptr.vmem [resolvable:$true] %s404_s17 }
  0x82   : > { %p2055_p4 = scmp.ne.s32.totalorder %s2902_s9, %s2054_s23  ;;  %p2951_p8 = scmp.ne.s32.totalorder %s2941_s21, 0 }
  0x83   : > { %p2061_p12 = scmp.lt.u32.totalorder %s2054_s23, %s2902_s9 }
  0x84   : > { %p2057_p11 = pnand %p2055_p4, %p2951_p8 }
  0x86   : > { %p2058_p13 = pneg %p2057_p11 }
  0x88   : > { %p2063_p3 = pnand %p2061_p12, %p2058_p13 }
  0x8a   : > { %2066 = shalt.err (!%p2063_p3)
}
  0x8b   : > { %s2067_s11 = scalar_lea.vmem %s405_s17, 16  ;;  %s2074_s28 = scalar_lea.vmem %s405_s17, 32 }
  0x8c   : > { %p2068_p9 = scmp.ne.s32.totalorder %s405_s17, %s2067_s11  ;;  %p2075_p10 = scmp.lt.s32.totalorder %s405_s17, %s405_s17 }
  0x8d   : > { %p2076_p5 = scmp.lt.s32.totalorder %s2074_s28, %s2067_s11 }
  0x8e   : > { %p2070_p0 = pnand %p2068_p9, %p2951_p8 }
  0x8f   : > { %p2077_p7 = por %p2076_p5, %p2075_p10 }
  0x90   : > { %p2071_p1 = pneg %p2070_p0 }
  0x92   : > { %p2078_p2 = pnand %p2077_p7, %p2071_p1 }
  0x94   : > { %2081 = shalt.err (!%p2078_p2)
}
  0x95   : > { %p2952_p4 = scmp.ne.s32.totalorder %s2939_s16, 0  ;;  %s425_s21 = scalar_lea.vmem [#allocation2], %s2492_s19 }
  0x96   : > { %s433_s15 = sshll.u32 %s425_s21, 4  ;;  %s2577_s16 = scalar_lea.hbm %s2895_s2, %s2495_s12  ;;  %s2571_s15 = int_to_ptr.vmem [resolvable:$true] %s433_s15 }
  0x97   : > { %1861 = dma.hbm_to_vmem [thread:$0]  (!%p2952_p4), %s2902_s9, 16, %s405_s17, [#allocation12]  }
  0x98   : > { %s422_s23 = scalar_lea.sflag [#allocation3], %s2489_s18  ;;  %s2082_s4 = scalar_lea.hbm %s2550_s1, 64 }
  0x99   : > { %p2083_p2 = scmp.ne.s32.totalorder %s2550_s1, %s2082_s4  ;;  %s2087_s28 = scalar_lea.hbm %s2893_s0, 128 }
  0x9a   : > { %p2088_p13 = scmp.lt.u32.totalorder %s2550_s1, %s2893_s0  ;;  %p2089_p12 = scmp.lt.u32.totalorder %s2087_s28, %s2082_s4 }
  0x9b   : > { %p2085_p8 = pnand %p2083_p2, %p2522_p6  ;;  %p2091_p9 = scmp.lt.u32.totalorder %s2082_s4, %s2550_s1 }
  0x9c   : > { %p2090_p3 = por %p2089_p12, %p2088_p13 }
  0x9d   : > { %p2086_p11 = pneg %p2085_p8 }
  0x9e   : > { %p2092_p0 = por %p2091_p9, %p2090_p3 }
  0xa0   : > { %p2093_p1 = pnand %p2092_p0, %p2086_p11 }
  0xa2   : > { %2096 = shalt.err (!%p2093_p1)
}
  0xa3   : > { %s2097_s12 = scalar_lea.vmem %s2571_s15, 64  ;;  %s2278_s20 = smov [#allocation2]  }
  0xa4   : > { %p2098_p10 = scmp.ne.s32.totalorder %s2571_s15, %s2097_s12  ;;  %s2102_s21 = sshll.u32 %s2278_s20, 4  ;;  %s2103_s21 = int_to_ptr.vmem [resolvable:$false] %s2102_s21 }
  0xa5   : > { %s2104_s30 = scalar_lea.vmem %s2103_s21, 128  ;;  %p2105_p4 = scmp.lt.s32.totalorder %s2571_s15, %s2103_s21 }
  0xa6   : > { %p2100_p5 = pnand %p2098_p10, %p2522_p6  ;;  %p2106_p2 = scmp.lt.s32.totalorder %s2104_s30, %s2097_s12 }
  0xa8   : > { %p2101_p7 = pneg %p2100_p5  ;;  %p2107_p8 = por %p2106_p2, %p2105_p4 }
  0xaa   : > { %p2108_p13 = pnand %p2107_p8, %p2101_p7 }
  0xac   : > { %2111 = shalt.err (!%p2108_p13)
}
  0xad   : > { %p2953_p11 = scmp.ne.s32.totalorder %s2947_s14, 0  ;;  %s462_s5 = scalar_lea.vmem [#allocation7], %s2492_s19 }
  0xae   : > { %s469_s4 = sshll.u32 %s462_s5, 4  ;;  %s1661_s10 = sshll.u32 %s2489_s18, 1  ;;  %s470_s4 = int_to_ptr.vmem [resolvable:$true] %s469_s4 }
  0xaf   : > { %1865 = dma.hbm_to_vmem [thread:$0]  (!%p2953_p11), %s2550_s1, 64, %s2571_s15, %s422_s23  }
  0xb0   : > { %s2112_s11 = scalar_lea.hbm %s2577_s16, 64  ;;  %s2117_s7 = scalar_lea.hbm %s2895_s2, 128 }
  0xb1   : > { %p2113_p12 = scmp.ne.s32.totalorder %s2577_s16, %s2112_s11  ;;  %p2118_p0 = scmp.lt.u32.totalorder %s2577_s16, %s2895_s2 }
  0xb2   : > { %p2119_p1 = scmp.lt.u32.totalorder %s2117_s7, %s2112_s11  ;;  %p2121_p5 = scmp.lt.u32.totalorder %s2112_s11, %s2577_s16 }
  0xb3   : > { %p2115_p3 = pnand %p2113_p12, %p2522_p6 }
  0xb4   : > { %p2120_p10 = por %p2119_p1, %p2118_p0 }
  0xb5   : > { %p2116_p9 = pneg %p2115_p3 }
  0xb6   : > { %p2122_p7 = por %p2121_p5, %p2120_p10 }
  0xb8   : > { %p2123_p4 = pnand %p2122_p7, %p2116_p9 }
  0xba   : > { %2126 = shalt.err (!%p2123_p4)
}
  0xbb   : > { %s2127_s1 = scalar_lea.vmem %s470_s4, 64  ;;  %s2279_s19 = smov [#allocation7]  }
  0xbc   : > { %p2128_p2 = scmp.ne.s32.totalorder %s470_s4, %s2127_s1  ;;  %s2132_s15 = sshll.u32 %s2279_s19, 4  ;;  %s2133_s15 = int_to_ptr.vmem [resolvable:$false] %s2132_s15 }
  0xbd   : > { %s2134_s23 = scalar_lea.vmem %s2133_s15, 128  ;;  %p2135_p12 = scmp.lt.s32.totalorder %s470_s4, %s2133_s15 }
  0xbe   : > { %p2130_p8 = pnand %p2128_p2, %p2522_p6  ;;  %p2136_p3 = scmp.lt.s32.totalorder %s2134_s23, %s2127_s1 }
  0xc0   : > { %p2131_p13 = pneg %p2130_p8  ;;  %p2137_p11 = por %p2136_p3, %p2135_p12 }
  0xc2   : > { %p2138_p0 = pnand %p2137_p11, %p2131_p13 }
  0xc4   : > { %2141 = shalt.err (!%p2138_p0)
}
  0xc5   : > { %p2954_p1 = scmp.ne.s32.totalorder %s2947_s14, 0  ;;  %s1662_s21 = sshll.u32 %s2266_s25, 5 }
  0xc6   : > { %s480_s30 = scalar_lea.vmem [#allocation8], %s1661_s10  ;;  %s2627_s17 = scalar_lea.hbm %s2896_s3, %s1662_s21 }
  0xc7   : > { %1871 = dma.hbm_to_vmem [thread:$0]  (!%p2954_p1), %s2577_s16, 64, %s470_s4, %s2516_s8  }
  0xc8   : > { %s488_s5 = sshll.u32 %s480_s30, 4  ;;  %s2955_s7 = sand.u32 1, %s2270_s26   ;;  %s489_s5 = int_to_ptr.vmem [resolvable:$true] %s488_s5 }
  0xc9   : > { %s477_s12 = scalar_lea.sflag [#allocation9], %s2955_s7  ;;  %s2142_s20 = scalar_lea.hbm %s2627_s17, 32 }
  0xca   : > { %p2143_p11 = scmp.ne.s32.totalorder %s2627_s17, %s2142_s20  ;;  %s2147_s16 = scalar_lea.hbm %s2896_s3, 64 }
  0xcb   : > { %p2148_p5 = scmp.lt.u32.totalorder %s2627_s17, %s2896_s3  ;;  %p2149_p7 = scmp.lt.u32.totalorder %s2147_s16, %s2142_s20 }
  0xcc   : > { %p2145_p9 = pnand %p2143_p11, %p2522_p6  ;;  %p2151_p2 = scmp.lt.u32.totalorder %s2142_s20, %s2627_s17 }
  0xcd   : > { %p2150_p4 = por %p2149_p7, %p2148_p5 }
  0xce   : > { %p2146_p10 = pneg %p2145_p9 }
  0xcf   : > { %p2152_p8 = por %p2151_p2, %p2150_p4 }
  0xd1   : > { %p2153_p13 = pnand %p2152_p8, %p2146_p10 }
  0xd3   : > { %2156 = shalt.err (!%p2153_p13)
}
  0xd4   : > { %s2157_s1 = scalar_lea.vmem %s489_s5, 32  ;;  %s2280_s19 = smov [#allocation8]  }
  0xd5   : > { %p2158_p12 = scmp.ne.s32.totalorder %s489_s5, %s2157_s1  ;;  %s2162_s15 = sshll.u32 %s2280_s19, 4  ;;  %s2163_s15 = int_to_ptr.vmem [resolvable:$false] %s2162_s15 }
  0xd6   : > { %s2164_s23 = scalar_lea.vmem %s2163_s15, 64  ;;  %p2165_p11 = scmp.lt.s32.totalorder %s489_s5, %s2163_s15 }
  0xd7   : > { %p2160_p3 = pnand %p2158_p12, %p2522_p6  ;;  %p2166_p9 = scmp.lt.s32.totalorder %s2164_s23, %s2157_s1 }
  0xd9   : > { %p2161_p0 = pneg %p2160_p3  ;;  %p2167_p1 = por %p2166_p9, %p2165_p11 }
  0xdb   : > { %p2168_p5 = pnand %p2167_p1, %p2161_p0 }
  0xdd   : > { %2171 = shalt.err (!%p2168_p5)
}
  0xde   : > { %p2956_p7 = scmp.ne.s32.totalorder %s2947_s14, 0  ;;  %p2957_p10 = scmp.ne.s32.totalorder %s2938_s13, 0 }
  0xdf   : > { %s2651_s24 = sand.u32 (!%p2957_p10), 1, %s2254_s22   ;;  %p2958_p6 = scmp.ne.s32.totalorder (!%p2957_p10), %s2935_s29, 0 }
  0xe0   : > { %1874 = dma.hbm_to_vmem [thread:$0]  (!%p2956_p7), %s2627_s17, 32, %s489_s5, %s477_s12  }
  0xe1   : > { %497 = sbr.rel (%p2957_p10) target bundleno = 2855 (0xb27), region = 68  ;;  %s2654_s21 = sshll.u32 (!%p2957_p10), %s2651_s24, 2 }
  0xe2   : > { %s500_s30 = scalar_lea.sflag (!%p2957_p10), [#allocation3], %s2651_s24  ;;  %s503_s11 = scalar_lea.vmem (!%p2957_p10), [#allocation2], %s2654_s21 }
  0xe8   : > { %2225 = dma.done.wait (%p2958_p6), %s500_s30, 64  }
  0xe9   : > { %2227 = vsyncadd (%p2958_p6), %s500_s30, 4294967232  ;;  %s508_s13 = sand.u32 1, %s2384_s27   ;;  %s512_s5 = scalar_lea.vmem [#allocation5], %s2654_s21 }
  0xea   : > { %s509_s14 = scalar_lea.sflag [#allocation6], %s508_s13 }
  0xeb   : > { %2229 = dma.done.wait (%p2958_p6), %s509_s14, 128  }
  0xec   : > { %2231 = vsyncadd (%p2958_p6), %s509_s14, 4294967168  ;;  %s1667_s28 = sshll.u32 %s2651_s24, 1  ;;  %s521_s17 = scalar_lea.vmem [#allocation7], %s2654_s21 }
  0xed   : > { %s527_s7 = scalar_lea.sflag [#allocation9], %s508_s13  ;;  %s2670_s12 = scalar_lea.vmem [#allocation8], %s1667_s28 }
  0xee   : > { %2233 = dma.done.wait (%p2958_p6), %s527_s7, 32  }
  0xef   : > { %2235 = vsyncadd (%p2958_p6), %s527_s7, 4294967264  ;;  %p2959_p1 = scmp.eq.s32.totalorder %s2384_s27, 0 }
  0xf1   : > { %2237 = dma.done.wait (%p2959_p1), [#allocation9], 256   ;;  %p2960_p4 = pmov %p2959_p1 }
  0xf2   : > { %p2961_p2 = pmov %p2959_p1 }
  0xf3   : > { %2239 = vsyncadd (%p2960_p4), [#allocation9], 4294967040 }
  0xf4   : > { %2241 = dma.done.wait (%p2961_p2), [#allocation12], 272   ;;  %p2962_p8 = pmov %p2959_p1 }
  0xf5   : > { %v2281_v0 = vmov 0.0   ;;  %vm2282_vm0 = vmmov 0   ;;  %v1946_v1 = vld [vmem:[%s2899_s6] sm:$0xff]   ;;  %v1948_v3 = vld [vmem:[%s2899_s6 + $0x8] sm:$0xff]   ;;  %vm625_vm1 = vcmask 261120   ;;  %s2963_s4 = sld [smem:[#allocation31_spill]] }
  0xf6   : > { %2243 = vsyncadd (%p2962_p8), [#allocation12], 4294967024  ;;  %1742 = vmatprep.subr.bf16.mxu1 %v2281_v0  ;;  %1734 = vmatprep.subr.bf16.mxu0 %v2281_v0  ;;  %v1947_v2 = vld [vmem:[#allocation10] sm:$0xff]   ;;  %v1949_v4 = vld [vmem:[#allocation10 + $0x8] sm:$0xff]   ;;  %s2964_s19 = sld [smem:[#allocation30_spill]]  ;;  %vm809_vm2 = vcmask 64512  }
  0xf7   : > { %1746 = vmatprep.mubr.msk.bf16.mxu1 %vm2282_vm0, %v2281_v0  ;;  %1738 = vmatprep.mubr.msk.bf16.mxu0 %vm2282_vm0, %v2281_v0  ;;  %v669_v5 = vld [vmem:[%s512_s5] sm:$0xf]  ;;  %v601_v6 = vld [vmem:[%s503_s11] sm:$0xf]  ;;  %s2283_s15 = smov 120   ;;  %v1951_v24 = vld [vmem:[#allocation11 + $0x8] sm:$0xff]  }
  0xf8   : > { %1743 = vmatpush3.bf16.msra.mxu1 %v1946_v1  ;;  %1735 = vmatpush3.bf16.msra.mxu0 %v1947_v2  ;;  %v1950_v23 = vld [vmem:[#allocation11] sm:$0xff]   ;;  %v807_v29 = vld [vmem:[%s2670_s12] sm:$0x3]  ;;  %v2284_v30 = vmov 0   ;;  %v1680_v55 = vld [vmem:[#allocation13] ss:$0 sm:$0xff] }
  0xf9   : > { %1744 = vmatprep.subr.bf16.mxu1 %v2281_v0  ;;  %1736 = vmatprep.subr.bf16.mxu0 %v2281_v0  ;;  %v736_v25 = vld [vmem:[%s521_s17] sm:$0xf]  ;;  %vm808_vm3 = vnez %v807_v29  ;;  %s2285_s23 = smov 112   ;;  %vm875_vm5 = vcmask 1043456   ;;  %s2967_s11 = sld [smem:[#allocation33_spill]] }
  0xfa   : > { %v856_v31 = vsel %vm808_vm3, 16843009, %v2284_v30  ;;  %s2286_s5 = smov 104   ;;  %s2968_s29 = sld [smem:[#allocation23_spill]] }
  0xfb   : > { %v1676_v7 = vld [vmem:[%s2963_s4] ss:$0 sm:$0xff]  ;;  %v857_v32 = vunpack.c.0.s8 %v856_v31  ;;  %s1671_s20 = sshll.u32 %s2651_s24, 3  ;;  %s2969_s18 = sld [smem:[#allocation34_spill]] }
  0xfc   : > { %1745 = vmatpush3.bf16.msra.mxu1 %v1948_v3  ;;  %1737 = vmatpush3.bf16.msra.mxu0 %v1949_v4  ;;  %v1672_v8 = vld [vmem:[%s2964_s19] ss:$0 sm:$0xff]  ;;  %s2970_s16 = sld [smem:[#allocation26_spill]]  ;;  %s597_s10 = scalar_lea.vmem [#allocation14], %s1671_s20 }
  0xfd   : > { %1758 = vmatprep.subr.bf16.mxu1 %v2281_v0  ;;  %1750 = vmatprep.subr.bf16.mxu0 %v2281_v0  ;;  %vm2742_vm4 = vcmp.ne.s32.totalorder %v857_v32, 0  ;;  %s1473_s1 = sshll.u32 %s597_s10, 4  ;;  %s1459_s13 = scalar_lea.sflag [#allocation4], %s2651_s24  ;;  %s2845_s1 = int_to_ptr.vmem [resolvable:$true] %s1473_s1 }
  0xfe   : > { %s2172_s14 = scalar_lea.vmem %s2845_s1, 128 }
  0xff   : > { %1747 = vmatmul.mubr.msk.bf16.vlgmr.msra.gmra.mrb[0].mxu1 %vm625_vm1, %v669_v5  ;;  %1739 = vmatmul.mubr.msk.bf16.vlgmr.msra.gmra.mrb[0].mxu0 %vm625_vm1, %v601_v6  ;;  %v1036_v5 = vld [vmem:[%s2967_s11 + $0x4] sm:$0xf]  ;;  %p2173_p13 = scmp.ne.s32.totalorder %s2845_s1, %s2172_s14 }
 0x100   : > { %1760 = vmatprep.mubr.msk.bf16.mxu1 %vm2282_vm0, %v2281_v0  ;;  %1754 = vmatprep.mubr.msk.bf16.mxu0 %vm2282_vm0, %v2281_v0  ;;  %v1041_v6 = vsel %vm875_vm5, %v1036_v5, 0  ;;  %s1698_s4 = sshll.u32 %s2968_s29, 7 }
 0x101   : > { %1751 = vmatpush3.bf16.msra.mxu0 %v1950_v23 }
 0x102   : > { %1752 = vmatprep.subr.bf16.mxu0 %v2281_v0  ;;  %p2973_p12 = scmp.ne.s32.totalorder %s2970_s16, 0 }
 0x104   : > { %p2174_p3 = pnand %p2173_p13, %p2973_p12 }
 0x105   : > { %1753 = vmatpush3.bf16.msra.mxu0 %v1951_v24 }
 0x106   : > { %1764 = vmatprep.subr.bf16.mxu0 %v2281_v0  ;;  %p2175_p0 = pneg %p2174_p3 }
 0x108   : > { %1755 = vmatmul.mubr.msk.bf16.vlgmr.msra.gmra.mrb[4].mxu0 %vm625_vm1, %v736_v25 }
 0x109   : > { %1766 = vmatprep.mubr.msk.bf16.mxu0 %vm2282_vm0, %v2281_v0 }
 0x1d2   : > { %v730_v9 = vpop.f32.mrb[0].mxu1  ;;  %v663_v12 = vpop.f32.mrb[0].mxu0 }
 0x1d3   : > { %v731_v10 = vadd.f32 %v1676_v7, %v730_v9  ;;  %v1748_v11 = vpop.f32.mrb[1].mxu1  ;;  %v664_v14 = vadd.f32 %v1672_v8, %v663_v12  ;;  %v1740_v15 = vpop.f32.mrb[1].mxu0 }
 0x1d4   : > { %v733_v13 = vpop.f32.mrb[2].mxu1  ;;  %v666_v18 = vpop.f32.mrb[2].mxu0  ;;  %v920_v11 = vld [vmem:[%s2967_s11] sm:$0xf] }
 0x1d5   : > { %v2714_v16 = vpack.c.bf16 %v731_v10, %v731_v10  ;;  %v1749_v17 = vpop.f32.mrb[3].mxu1  ;;  %v803_v19 = vmul.f32 0.35355338, %v664_v14  ;;  %v1741_v20 = vpop.f32.mrb[3].mxu0  ;;  %v1087_v14 = vsel %vm875_vm5, %v920_v11, 0 }
 0x1d7   : > { %925 = vrot.lane.b32.xlu0 %v2714_v16, %s2283_s15  ;;  %v814_v21 = vsel %vm809_vm2, %v2714_v16, 0  ;;  %v2720_v22 = vpack.c.bf16 %v803_v19, %v803_v19 }
 0x1d8   : > { %1759 = vmatpush3.bf16.xpose.msra.mxu1 %v814_v21 }
 0x1d9   : > { %1770 = vmatprep.subr.bf16.mxu1 %v2281_v0 }
 0x1db   : > { %922 = vrot.lane.b32.xlu0 %v2720_v22, %s2283_s15  ;;  %v797_v49 = vpop.f32.mrb[4].mxu0 }
 0x1dc   : > { %v1756_v50 = vpop.f32.mrb[5].mxu0  ;;  %v798_v56 = vadd.f32 %v1680_v55, %v797_v49 }
 0x1dd   : > { %v800_v51 = vpop.f32.mrb[6].mxu0 }
 0x1de   : > { %v1757_v52 = vpop.f32.mrb[7].mxu0  ;;  %v2753_v57 = vpack.c.bf16 %v798_v56, %v798_v56 }
 0x1df   : > { %1761 = vmatmul.mubr.msk.bf16.vlgmr.msra.gmra.mrb[4].mxu1 %vm809_vm2, %v2720_v22 }
 0x1e0   : > { %1772 = vmatprep.mubr.msk.bf16.mxu1 %vm2282_vm0, %v2281_v0  ;;  %v877_v58 = vsel %vm875_vm5, %v2753_v57, 0 }
 0x1e1   : > { %1765 = vmatpush3.bf16.msra.mxu0 %v877_v58 }
 0x1e2   : > { %1776 = vmatprep.subr.bf16.mxu0 %v2281_v0 }
 0x249   : > { %v926_v26 = vpop.permute.xlu0 %925 }
 0x24a   : > { %v931_v27 = vsel %vm809_vm2, %v926_v26, 0 }
 0x24b   : > { %1771 = vmatpush3.bf16.xpose.msra.mxu1 %v931_v27 }
 0x24c   : > { %1782 = vmatprep.subr.bf16.mxu1 %v2281_v0 }
 0x24d   : > { %v923_v28 = vpop.permute.xlu0 %922 }
 0x252   : > { %1773 = vmatmul.mubr.msk.bf16.vlgmr.msra.gmra.mrb[8].mxu1 %vm809_vm2, %v923_v28 }
 0x253   : > { %1784 = vmatprep.mubr.msk.bf16.mxu1 %vm2282_vm0, %v2281_v0  ;;  %1783 = vmatpush3.bf16.msra.mxu1 %v1041_v6 }
 0x254   : > { %1794 = vmatprep.subr.bf16.mxu1 %v2281_v0 }
 0x2b2   : > { %v850_v34 = vpop.f32.mrb[4].mxu1 }
 0x2b3   : > { %v859_v35 = vsel %vm2742_vm4, %v850_v34, -1e+09  ;;  %v1762_v36 = vpop.f32.mrb[5].mxu1 }
 0x2b4   : > { %v853_v37 = vpop.f32.mrb[6].mxu1  ;;  %v860_v38 = vsel %vm809_vm2, %v859_v35, -inf }
 0x2b5   : > { %861 = vmax.xlane.f32.xlu1 %v860_v38  ;;  %v1763_v39 = vpop.f32.mrb[7].mxu1 }
 0x325   : > { %v967_v40 = vpop.f32.mrb[8].mxu1 }
 0x326   : > { %v973_v41 = vsel %vm2742_vm4, %v967_v40, -1e+09  ;;  %v1774_v42 = vpop.f32.mrb[9].mxu1 }
 0x327   : > { %v970_v43 = vpop.f32.mrb[10].mxu1  ;;  %v974_v44 = vsel %vm809_vm2, %v973_v41, -inf }
 0x328   : > { %975 = vmax.xlane.f32.xlu1 %v974_v44  ;;  %v1775_v45 = vpop.f32.mrb[11].mxu1 }
 0x342   : > { %v862_v46 = vpop.xlane.xlu1 %861 }
 0x343   : > { %v863_v47 = vsub.f32 %v859_v35, %v862_v46 }
 0x345   : > { %v864_v48 = vmul.f32 1.442695, %v863_v47 }
 0x347   : > { %1952 = vpow2.f32 %v864_v48 }
 0x351   : > { %v1953_v53 = vpop.eup %1952 }
 0x352   : > { %v866_v54 = vsel %vm809_vm2, %v1953_v53, 0.0 }
 0x353   : > { %867 = vadd.xlane.f32.xlu0 %v866_v54 }
 0x369   : > { %1192 = vrot.lane.b32.xlu0 %v2753_v57, %s2285_s23 }
 0x3b5   : > { %v976_v59 = vpop.xlane.xlu1 %975 }
 0x3b6   : > { %v977_v60 = vsub.f32 %v973_v41, %v976_v59 }
 0x3b8   : > { %v978_v61 = vmul.f32 1.442695, %v977_v60 }
 0x3ba   : > { %1954 = vpow2.f32 %v978_v61 }
 0x3c4   : > { %v1955_v62 = vpop.eup %1954 }
 0x3c5   : > { %v980_v63 = vsel %vm809_vm2, %v1955_v62, 0.0 }
 0x3c6   : > { %981 = vadd.xlane.f32.xlu1 %v980_v63 }
 0x3d7   : > { %987 = vrot.lane.b32.xlu1 %v2753_v57, %s2283_s15 }
 0x3db   : > { %1131 = vrot.lane.b32.xlu1 %v2714_v16, %s2285_s23 }
 0x3df   : > { %1129 = vrot.lane.b32.xlu1 %v2720_v22, %s2285_s23  ;;  %s2971_s23 = sld [smem:[#allocation35_spill]] }
 0x3e0   : > { %v868_v1 = vpop.xlane.xlu0 %867 }
 0x3e1   : > { %1956 = vrcp.f32 %v868_v1 }
 0x3e4   : > { %v1193_v15 = vpop.permute.xlu0 %1192 }
 0x3e5   : > { %v1198_v21 = vsel %vm875_vm5, %v1193_v15, 0  ;;  %s2972_s30 = smov %s2971_s23  ;;  %s2843_s21 = scalar_lea.hbm %s2971_s23, %s1698_s4 }
 0x3eb   : > { %v1957_v2 = vpop.eup %1956 }
 0x3ec   : > { %v870_v3 = vmul.f32 %v1957_v2, %v1953_v53 }
 0x3ee   : > { %v871_v4 = vpack.c.bf16 %v870_v3, %v870_v3 }
 0x3f0   : > { %1767 = vmatmul.mubr.msk.bf16.vlgmr.msra.gmra.mrb[8].mxu0 %vm809_vm2, %v871_v4 }
 0x3f1   : > { %1778 = vmatprep.mubr.msk.bf16.mxu0 %vm2282_vm0, %v2281_v0 }
 0x453   : > { %v982_v7 = vpop.xlane.xlu1 %981 }
 0x454   : > { %1958 = vrcp.f32 %v982_v7 }
 0x457   : > { %v988_v8 = vpop.permute.xlu1 %987 }
 0x458   : > { %v993_v9 = vsel %vm875_vm5, %v988_v8, 0 }
 0x459   : > { %1777 = vmatpush3.bf16.msra.mxu0 %v993_v9 }
 0x45a   : > { %1788 = vmatprep.subr.bf16.mxu0 %v2281_v0 }
 0x45b   : > { %v1132_v24 = vpop.permute.xlu1 %1131 }
 0x45c   : > { %v1137_v29 = vsel %vm809_vm2, %v1132_v24, 0 }
 0x45e   : > { %v1959_v10 = vpop.eup %1958 }
 0x45f   : > { %v984_v12 = vmul.f32 %v1959_v10, %v1955_v62  ;;  %v1130_v31 = vpop.permute.xlu1 %1129 }
 0x461   : > { %v985_v13 = vpack.c.bf16 %v984_v12, %v984_v12 }
 0x463   : > { %1779 = vmatmul.mubr.msk.bf16.vlgmr.msra.gmra.mrb[12].mxu0 %vm809_vm2, %v985_v13 }
 0x464   : > { %1789 = vmatpush3.bf16.msra.mxu0 %v1087_v14  ;;  %1790 = vmatprep.mubr.msk.bf16.mxu0 %vm2282_vm0, %v2281_v0 }
 0x465   : > { %1800 = vmatprep.subr.bf16.mxu0 %v2281_v0 }
 0x4c3   : > { %v913_v17 = vpop.f32.mrb[8].mxu0 }
 0x4c4   : > { %v919_v18 = vpack.c.bf16 %v913_v17, %v913_v17  ;;  %v1768_v19 = vpop.f32.mrb[9].mxu0 }
 0x4c5   : > { %v916_v20 = vpop.f32.mrb[10].mxu0 }
 0x4c6   : > { %v1769_v23 = vpop.f32.mrb[11].mxu0  ;;  %1791 = vmatmul.mubr.msk.bf16.vlgmr.msra.gmra.mrb[16].mxu0 %vm809_vm2, %v919_v18 }
 0x4c7   : > { %1801 = vmatpush3.bf16.msra.mxu0 %v1198_v21  ;;  %1802 = vmatprep.mubr.msk.bf16.mxu0 %vm2282_vm0, %v2281_v0 }
 0x4c8   : > { %1812 = vmatprep.subr.bf16.mxu0 %v2281_v0 }
 0x536   : > { %v1029_v25 = vpop.f32.mrb[12].mxu0 }
 0x537   : > { %v1035_v26 = vpack.c.bf16 %v1029_v25, %v1029_v25  ;;  %v1780_v27 = vpop.f32.mrb[13].mxu0 }
 0x538   : > { %v1032_v28 = vpop.f32.mrb[14].mxu0 }
 0x539   : > { %v1781_v30 = vpop.f32.mrb[15].mxu0  ;;  %1785 = vmatmul.mubr.msk.bf16.vlgmr.msra.gmra.mrb[12].mxu1 %vm809_vm2, %v1035_v26 }
 0x53a   : > { %1795 = vmatpush3.bf16.xpose.msra.mxu1 %v1137_v29  ;;  %1796 = vmatprep.mubr.msk.bf16.mxu1 %vm2282_vm0, %v2281_v0 }
 0x53b   : > { %1806 = vmatprep.subr.bf16.mxu1 %v2281_v0 }
 0x541   : > { %1797 = vmatmul.mubr.msk.bf16.vlgmr.msra.gmra.mrb[16].mxu1 %vm809_vm2, %v1130_v31 }
 0x542   : > { %1808 = vmatprep.mubr.msk.bf16.mxu1 %vm2282_vm0, %v2281_v0 }
 0x599   : > { %v1123_v32 = vpop.f32.mrb[16].mxu0 }
 0x59a   : > { %v1792_v34 = vpop.f32.mrb[17].mxu0 }
 0x59b   : > { %v1126_v35 = vpop.f32.mrb[18].mxu0 }
 0x59c   : > { %v1793_v36 = vpop.f32.mrb[19].mxu0 }
 0x60c   : > { %v1077_v37 = vpop.f32.mrb[12].mxu1 }
 0x60d   : > { %v2795_v38 = vadd.f32 %v1123_v32, %v1077_v37  ;;  %v1786_v39 = vpop.f32.mrb[13].mxu1  ;;  %v1696_v32 = vld [vmem:[%s2969_s18] ss:$0 sm:$0xff] }
 0x60e   : > { %v1080_v40 = vpop.f32.mrb[14].mxu1 }
 0x60f   : > { %v1787_v41 = vpop.f32.mrb[15].mxu1 }
 0x614   : > { %v1173_v42 = vpop.f32.mrb[16].mxu1 }
 0x615   : > { %v1179_v43 = vsel %vm2742_vm4, %v1173_v42, -1e+09  ;;  %v1798_v44 = vpop.f32.mrb[17].mxu1 }
 0x616   : > { %v1176_v45 = vpop.f32.mrb[18].mxu1  ;;  %v1180_v46 = vsel %vm809_vm2, %v1179_v43, -inf }
 0x617   : > { %1181 = vmax.xlane.f32.xlu1 %v1180_v46  ;;  %v1799_v47 = vpop.f32.mrb[19].mxu1 }
 0x6a4   : > { %v1182_v48 = vpop.xlane.xlu1 %1181 }
 0x6a5   : > { %v1183_v49 = vsub.f32 %v1179_v43, %v1182_v48 }
 0x6a7   : > { %v1184_v50 = vmul.f32 1.442695, %v1183_v49 }
 0x6a9   : > { %1960 = vpow2.f32 %v1184_v50 }
 0x6b3   : > { %v1961_v51 = vpop.eup %1960 }
 0x6b4   : > { %v1186_v52 = vsel %vm809_vm2, %v1961_v51, 0.0 }
 0x6b5   : > { %1187 = vadd.xlane.f32.xlu0 %v1186_v52 }
 0x6cb   : > { %1291 = vrot.lane.b32.xlu0 %v2714_v16, %s2286_s5 }
 0x6cf   : > { %1289 = vrot.lane.b32.xlu0 %v2720_v22, %s2286_s5  ;;  %v1241_v22 = vld [vmem:[%s2967_s11 + $0x8] sm:$0xf] }
 0x6d0   : > { %v1246_v60 = vsel %vm875_vm5, %v1241_v22, 0 }
 0x6d1   : > { %1807 = vmatpush3.bf16.msra.mxu1 %v1246_v60 }
 0x6d2   : > { %1818 = vmatprep.subr.bf16.mxu1 %v2281_v0 }
 0x742   : > { %v1188_v53 = vpop.xlane.xlu0 %1187 }
 0x743   : > { %1962 = vrcp.f32 %v1188_v53 }
 0x746   : > { %v1292_v56 = vpop.permute.xlu0 %1291 }
 0x747   : > { %v1297_v59 = vsel %vm809_vm2, %v1292_v56, 0 }
 0x74a   : > { %v1290_v16 = vpop.permute.xlu0 %1289 }
 0x74d   : > { %v1963_v54 = vpop.eup %1962 }
 0x74e   : > { %v1190_v55 = vmul.f32 %v1963_v54, %v1961_v51 }
 0x750   : > { %v1191_v58 = vpack.c.bf16 %v1190_v55, %v1190_v55 }
 0x752   : > { %1803 = vmatmul.mubr.msk.bf16.vlgmr.msra.gmra.mrb[20].mxu0 %vm809_vm2, %v1191_v58 }
 0x753   : > { %1813 = vmatpush3.bf16.xpose.msra.mxu0 %v1297_v59  ;;  %1814 = vmatprep.mubr.msk.bf16.mxu0 %vm2282_vm0, %v2281_v0 }
 0x754   : > { %1824 = vmatprep.subr.bf16.mxu0 %v2281_v0 }
 0x75a   : > { %1815 = vmatmul.mubr.msk.bf16.vlgmr.msra.gmra.mrb[24].mxu0 %vm809_vm2, %v1290_v16 }
 0x75b   : > { %1826 = vmatprep.mubr.msk.bf16.mxu0 %vm2282_vm0, %v2281_v0 }
 0x825   : > { %v1234_v61 = vpop.f32.mrb[20].mxu0 }
 0x826   : > { %v1240_v62 = vpack.c.bf16 %v1234_v61, %v1234_v61  ;;  %v1804_v63 = vpop.f32.mrb[21].mxu0 }
 0x827   : > { %v1237_v1 = vpop.f32.mrb[22].mxu0 }
 0x828   : > { %v1805_v2 = vpop.f32.mrb[23].mxu0  ;;  %1809 = vmatmul.mubr.msk.bf16.vlgmr.msra.gmra.mrb[20].mxu1 %vm809_vm2, %v1240_v62 }
 0x829   : > { %1820 = vmatprep.mubr.msk.bf16.mxu1 %vm2282_vm0, %v2281_v0  ;;  %v1401_v0 = vld [vmem:[%s2967_s11 + $0xc] sm:$0xf] }
 0x82a   : > { %v1406_v33 = vsel %vm875_vm5, %v1401_v0, 0 }
 0x82b   : > { %1825 = vmatpush3.bf16.msra.mxu0 %v1406_v33 }
 0x82d   : > { %v1333_v3 = vpop.f32.mrb[24].mxu0 }
 0x82e   : > { %v1339_v4 = vsel %vm2742_vm4, %v1333_v3, -1e+09  ;;  %v1816_v5 = vpop.f32.mrb[25].mxu0 }
 0x82f   : > { %v1336_v6 = vpop.f32.mrb[26].mxu0  ;;  %v1340_v7 = vsel %vm809_vm2, %v1339_v4, -inf }
 0x830   : > { %1341 = vmax.xlane.f32.xlu0 %v1340_v7  ;;  %v1817_v8 = vpop.f32.mrb[27].mxu0 }
 0x8bd   : > { %v1342_v9 = vpop.xlane.xlu0 %1341 }
 0x8be   : > { %v1343_v10 = vsub.f32 %v1339_v4, %v1342_v9 }
 0x8c0   : > { %v1344_v11 = vmul.f32 1.442695, %v1343_v10 }
 0x8c2   : > { %1964 = vpow2.f32 %v1344_v11 }
 0x8cc   : > { %v1965_v12 = vpop.eup %1964 }
 0x8cd   : > { %v1346_v13 = vsel %vm809_vm2, %v1965_v12, 0.0 }
 0x8ce   : > { %1347 = vadd.xlane.f32.xlu1 %v1346_v13 }
 0x8df   : > { %1352 = vrot.lane.b32.xlu1 %v2753_v57, %s2286_s5  ;;  %s2287_s5 = smov [#allocation14]  }
 0x8e0   : > { %s2176_s28 = sshll.u32 %s2287_s5, 4  ;;  %s2177_s28 = int_to_ptr.vmem [resolvable:$false] %s2176_s28 }
 0x8e1   : > { %s2178_s17 = scalar_lea.vmem %s2177_s28, 256  ;;  %p2179_p11 = scmp.lt.s32.totalorder %s2845_s1, %s2177_s28 }
 0x8e2   : > { %p2180_p9 = scmp.lt.s32.totalorder %s2178_s17, %s2172_s14 }
 0x8e4   : > { %p2181_p5 = por %p2180_p9, %p2179_p11 }
 0x8e6   : > { %p2182_p7 = pnand %p2181_p5, %p2175_p0 }
 0x8fb   : > { %v1282_v14 = vpop.f32.mrb[20].mxu1 }
 0x8fc   : > { %v1288_v15 = vadd.f32 %v1282_v14, %v2795_v38  ;;  %v1810_v17 = vpop.f32.mrb[21].mxu1 }
 0x8fd   : > { %v1285_v18 = vpop.f32.mrb[22].mxu1 }
 0x8fe   : > { %v1811_v19 = vpop.f32.mrb[23].mxu1 }
 0x95b   : > { %v1348_v20 = vpop.xlane.xlu1 %1347 }
 0x95c   : > { %1966 = vrcp.f32 %v1348_v20 }
 0x95f   : > { %v1353_v21 = vpop.permute.xlu1 %1352 }
 0x960   : > { %v1358_v57 = vsel %vm875_vm5, %v1353_v21, 0 }
 0x961   : > { %1819 = vmatpush3.bf16.msra.mxu1 %v1358_v57 }
 0x966   : > { %v1967_v23 = vpop.eup %1966 }
 0x967   : > { %v1350_v24 = vmul.f32 %v1967_v23, %v1965_v12 }
 0x969   : > { %v1351_v25 = vpack.c.bf16 %v1350_v24, %v1350_v24 }
 0x96b   : > { %1821 = vmatmul.mubr.msk.bf16.vlgmr.msra.gmra.mrb[24].mxu1 %vm809_vm2, %v1351_v25 }
 0xa3e   : > { %v1394_v26 = vpop.f32.mrb[24].mxu1 }
 0xa3f   : > { %v1400_v27 = vpack.c.bf16 %v1394_v26, %v1394_v26  ;;  %v1822_v28 = vpop.f32.mrb[25].mxu1 }
 0xa40   : > { %v1397_v29 = vpop.f32.mrb[26].mxu1 }
 0xa41   : > { %v1823_v30 = vpop.f32.mrb[27].mxu1  ;;  %1827 = vmatmul.mubr.msk.bf16.vlgmr.msra.gmra.mrb[28].mxu0 %vm809_vm2, %v1400_v27 }
 0xb14   : > { %v1442_v31 = vpop.f32.mrb[28].mxu0 }
 0xb15   : > { %v1448_v34 = vadd.f32 %v1442_v31, %v1288_v15  ;;  %v1828_v35 = vpop.f32.mrb[29].mxu0 }
 0xb16   : > { %v1445_v36 = vpop.f32.mrb[30].mxu0 }
 0xb17   : > { %v1456_v37 = vadd.f32 %v1696_v32, %v1448_v34  ;;  %v1829_v38 = vpop.f32.mrb[31].mxu0 }
 0xb19   : > { %1457 = vst.msk [vmem:[%s597_s10] sm:$0xff] %vm625_vm1, %v1456_v37 }
 0xb1a   : > { %2185 = shalt.err (!%p2182_p7)
}
 0xb1b   : > { %s2186_s24 = scalar_lea.hbm %s2843_s21, 128  ;;  %s2190_s29 = scalar_lea.hbm %s2972_s30, 256 }
 0xb1c   : > { %p2187_p10 = scmp.ne.s32.totalorder %s2843_s21, %s2186_s24  ;;  %p2191_p4 = scmp.lt.u32.totalorder %s2843_s21, %s2972_s30 }
 0xb1d   : > { %p2192_p2 = scmp.lt.u32.totalorder %s2190_s29, %s2186_s24  ;;  %p2194_p13 = scmp.lt.u32.totalorder %s2186_s24, %s2843_s21 }
 0xb1e   : > { %p2188_p6 = pnand %p2187_p10, %p2973_p12 }
 0xb1f   : > { %p2193_p8 = por %p2192_p2, %p2191_p4 }
 0xb20   : > { %p2189_p1 = pneg %p2188_p6 }
 0xb21   : > { %p2195_p3 = por %p2194_p13, %p2193_p8 }
 0xb23   : > { %p2196_p0 = pnand %p2195_p3, %p2189_p1 }
 0xb25   : > { %2199 = shalt.err (!%p2196_p0)
}
 0xb26   : > { %1850 = dma.vmem_to_hbm [thread:$0]  (%p2973_p12), %s2845_s1, 128, %s2843_s21, %s1459_s13  }
 0xb27 PF: > { %s2974_s8 = sld [smem:[#allocation21_spill]]  ;;  %s2975_s18 = sld [smem:[#allocation24_spill]] }
 0xb28   : > { %p2977_p9 = scmp.ge.s32.totalorder %s2270_s26, 2 }
 0xb2d   : > { %s1485_s4 = sand.u32 1, %s2974_s8   ;;  %p2976_p11 = scmp.ne.s32.totalorder %s2975_s18, 0 }
 0xb2e   : > { %s1486_s10 = scalar_lea.sflag [#allocation4], %s1485_s4 }
 0xb2f   : > { %p1876_p5 = pnand %p2977_p9, %p2976_p11 }
 0xb31   : > { %2245 = dma.done.wait (!%p1876_p5), %s1486_s10, 128  }
 0xb32   : > { %2247 = vsyncadd (!%p1876_p5), %s1486_s10, 4294967168  ;;  %s35_s26 = sadd.s32 1, %s2270_s26   ;;  %s2978_s19 = sld [smem:[#allocation22_spill]] }
 0xb33   : > { %p32_p7 = scmp.ge.s32.totalorder %s35_s26, 4   ;;  %s2979_s23 = sld [smem:[#allocation27_spill]] }
 0xb34   : > { %s2980_s16 = sld [smem:[#allocation25_spill]]  ;;  %s2981_s21 = smov %s2254_s22 }
 0xb35   : > { %s2983_s24 = smov %s2266_s25  ;;  %34 = sbr.rel (!%p32_p7) target bundleno = 20 (0x14), region = 162 }
 0xb38   : > { %s2982_s22 = smov %s2978_s19 }
 0xb3a   : > { %s2984_s25 = smov %s2980_s16 }
 0xb3c   :  { %1491 = vsyncpa [#allocation3], 1 }
 0xb3d   :  { %1493 = vsyncpa [#allocation3 + $0x1], 1 }
 0xb3e   :  { %1494 = vsyncpa [#allocation6], 1 }
 0xb3f   :  { %1496 = vsyncpa [#allocation6 + $0x1], 1 }
 0xb40   :  { %1497 = vsyncpa [#allocation9], 1 }
 0xb41   :  { %1499 = vsyncpa [#allocation9 + $0x1], 1 }
 0xb42   :  { %1500 = vsyncpa [#allocation12], 1 }
 0xb43   :  { %1501 = vsyncpa [#allocation4], 1 }
 0xb44   :  { %1503 = vsyncpa [#allocation4 + $0x1], 1 }

</bundles_post_ra>
